<compile_context>
chip_gen: v6e
topology: v6e:2x2x1
jax: 0.10.0
libtpu: 0.0.40
codegen_flags: <defaults>
</compile_context>

<pallas_src>
import jax
import jax.numpy as jnp
from jax import lax
from jax.experimental import pallas as pl
from jax.experimental.pallas import tpu as pltpu

N = 16        # number of graph nodes (multiple of 8 for sublane alignment)
E = 32        # number of edges
LANES = 128   # lane width for padded feature dims and padded edge count


def gcn_kernel(edges_ref, x_ref, wmat_ref, vrow_ref, out_ref):
    n = x_ref.shape[0]
    e = edges_ref.shape[1]
    f32 = jnp.float32

    # ---- vectorized adjacency build: one-hot compares + one MXU matmul ----
    src = edges_ref[0:1, :]                                   # [1,E] int32
    dst = edges_ref[1:2, :]                                   # [1,E] int32
    node_ids = lax.broadcasted_iota(jnp.int32, (n, e), 0)     # node id along sublanes
    onehot_src = (node_ids == src).astype(f32)                # [N,E]; pad (-1) edges -> 0
    onehot_dst = (node_ids == dst).astype(f32)                # [N,E]
    a = pl.dot(onehot_dst, onehot_src, trans_b=True)          # [N,N] edge counts (dst,src)

    # degree of (A + I) = 1 + row-sum of A.  D^-1/2 is kept as an [N,1] column
    # and folded into the propagated features, so no transpose / row-degree
    # accumulator is needed (A_hat @ h == dinv * ((A+I) @ (dinv * h))).
    deg = 1.0 + jnp.sum(a, axis=1, keepdims=True)             # [N,1]
    dinv = lax.rsqrt(deg)                                     # [N,1]

    rows = lax.broadcasted_iota(jnp.int32, (n, n), 0)
    cols = lax.broadcasted_iota(jnp.int32, (n, n), 1)
    a = a + (rows == cols).astype(f32)                        # self loops

    def propagate(h):
        return dinv * jnp.dot(a, dinv * h, preferred_element_type=f32)

    # ---- static slices into the two packed weight slabs ----
    w2  = wmat_ref[0 * LANES:1 * LANES, :]        # [128,128], rows 0:16 / cols 0:32 live
    wf1 = wmat_ref[1 * LANES:2 * LANES, :]        # [128,128], rows 0:32 live, 1/n folded
    wf2 = wmat_ref[2 * LANES:3 * LANES, :]        # [128,128], rows 0:10 live
    w1  = vrow_ref[0:1, :]                        # [1,128] conv1 weight row
    b1  = vrow_ref[1:2, :]
    b2  = vrow_ref[2:3, :]
    bf1 = vrow_ref[3:4, :]
    bf2 = vrow_ref[4:5, :]

    # ---- GCNConv1: in_features == 1 -> VPU broadcast outer product ----
    h = x_ref[...] * w1                                       # [N,128]
    h = jnp.maximum(propagate(h) + b1, 0.0)

    # ---- GCNConv2 (full-depth zero-padded weights, no lane slicing) ----
    h = jnp.dot(h, w2, preferred_element_type=f32)
    h = jnp.maximum(propagate(h) + b2, 0.0)

    # ---- global_mean_pool over all nodes (1/n folded into wf1) ----
    pooled = jnp.sum(h, axis=0, keepdims=True)                # [1,128]

    # ---- fc1 + ReLU, fc2; store stays lane-dense [1,128] ----
    z = jnp.maximum(jnp.dot(pooled, wf1, preferred_element_type=f32) + bf1, 0.0)
    out_ref[...] = jnp.dot(z, wf2, preferred_element_type=f32) + bf2


def _pad_rows(arr, rows):
    out = jnp.zeros((rows, LANES), jnp.float32)
    return out.at[:arr.shape[0], :arr.shape[1]].set(arr.astype(jnp.float32))


def prepare_params(params, n):
    """One-time weight prep: transpose, zero-pad to full [128,128] depth (so the
    kernel never lane-slices activations), fold the 1/n mean-pool scale into
    fc1, and coalesce everything into two f32 slabs (2 weight DMAs total).
    Correctness of the full-width matmuls relies on the padded rows/lanes
    being exactly zero."""
    wmat = jnp.concatenate([
        _pad_rows(params["w2"].T, LANES),        # GCNConv2 weight
        _pad_rows(params["wf1"].T / n, LANES),   # fc1 weight, mean-pool 1/n folded
        _pad_rows(params["wf2"].T, LANES),       # fc2 weight
    ], axis=0)                                   # [384,128] f32

    vrow = jnp.zeros((8, LANES), jnp.float32)
    vrow = vrow.at[0, :params["w1"].shape[0]].set(params["w1"][:, 0])
    vrow = vrow.at[1, :params["b1"].shape[0]].set(params["b1"])
    vrow = vrow.at[2, :params["b2"].shape[0]].set(params["b2"])
    vrow = vrow.at[3, :params["bf1"].shape[0]].set(params["bf1"])
    vrow = vrow.at[4, :params["bf2"].shape[0]].set(params["bf2"])
    return {"wmat": wmat, "vrow": vrow}


@jax.jit
def gcn_forward(x, edge_index, prepped):
    e = edge_index.shape[1]
    e_pad = max(LANES, ((e + LANES - 1) // LANES) * LANES)
    # lane-dense edge block; pad index -1 never equals a node id
    edges = jnp.full((2, e_pad), -1, jnp.int32)
    edges = edges.at[:, :e].set(edge_index.astype(jnp.int32))

    vmem = pl.BlockSpec(memory_space=pltpu.MemorySpace.VMEM)
    out = pl.pallas_call(
        gcn_kernel,
        out_shape=jax.ShapeDtypeStruct((1, LANES), jnp.float32),
        in_specs=[vmem, vmem, vmem, vmem],
        out_specs=vmem,
    )(edges, x, prepped["wmat"], prepped["vrow"])
    return out[:, :2]                                          # [1, 2]


def _normalized_adjacency(edge_index, n):
    src, dst = edge_index[0], edge_index[1]
    a = jnp.zeros((n, n), jnp.float32).at[dst, src].add(1.0)   # message src -> dst
    a = a + jnp.eye(n, dtype=jnp.float32)                      # self loops
    deg = jnp.sum(a, axis=1)
    dinv = 1.0 / jnp.sqrt(deg)
    return dinv[:, None] * a * dinv[None, :]


def gcn_reference(x, edge_index, params):
    a_hat = _normalized_adjacency(edge_index, x.shape[0])
    h = jnp.maximum(a_hat @ (x @ params["w1"].T) + params["b1"], 0.0)
    h = jnp.maximum(a_hat @ (h @ params["w2"].T) + params["b2"], 0.0)
    p = jnp.mean(h, axis=0, keepdims=True)
    z = jnp.maximum(p @ params["wf1"].T + params["bf1"], 0.0)
    return z @ params["wf2"].T + params["bf2"]


def init_params(key):
    ks = jax.random.split(key, 8)
    # PyTorch-style weight shapes: [out_features, in_features]
    return {
        "w1":  jax.random.normal(ks[0], (16, 1),  jnp.float32) * 0.1,   # GCNConv(1, 16)
        "b1":  jax.random.normal(ks[1], (16,),    jnp.float32) * 0.1,
        "w2":  jax.random.normal(ks[2], (32, 16), jnp.float32) * 0.1,   # GCNConv(16, 32)
        "b2":  jax.random.normal(ks[3], (32,),    jnp.float32) * 0.1,
        "wf1": jax.random.normal(ks[4], (10, 32), jnp.float32) * 0.1,   # Linear(32, 10)
        "bf1": jax.random.normal(ks[5], (10,),    jnp.float32) * 0.1,
        "wf2": jax.random.normal(ks[6], (2, 10),  jnp.float32) * 0.1,   # Linear(10, 2)
        "bf2": jax.random.normal(ks[7], (2,),     jnp.float32) * 0.1,
    }


if __name__ == "__main__":
    key = jax.random.PRNGKey(0)
    kp, kx, ke = jax.random.split(key, 3)

    params = init_params(kp)
    x = jax.random.normal(kx, (N, 1), jnp.float32)                       # data.x
    edge_index = jax.random.randint(ke, (2, E), 0, N, dtype=jnp.int32)   # data.edge_index

    prepped = prepare_params(params, N)          # static weight prep, once at init

    out = gcn_forward(x, edge_index, prepped)
    out = jax.block_until_ready(out)

    ref = gcn_reference(x, edge_index, params)
    assert out.shape == (1, 2), out.shape
    # all-f32 pipeline (MXU f32 accumulation) -> tight tolerance
    assert jnp.allclose(out, ref, atol=1e-3, rtol=1e-3), (out, ref)

    print("KERNEL_OK")
</pallas_src>

<mosaic_0001>
module attributes {stable_mosaic.version = 11 : i64} {
  func.func @gcn_kernel(%arg0: memref<2x128xi32, #tpu.memory_space<vmem>>, %arg1: memref<16x1xf32, #tpu.memory_space<vmem>>, %arg2: memref<384x128xf32, #tpu.memory_space<vmem>>, %arg3: memref<8x128xf32, #tpu.memory_space<vmem>>, %arg4: memref<1x128xf32, #tpu.memory_space<vmem>>) attributes {dimension_semantics = [], scalar_prefetch = 0 : i64, scratch_operands = 0 : i64, tpu.core_type = #tpu.core_type<tc>} {
    %c0 = arith.constant 0 : index
    %c0_0 = arith.constant 0 : index
    %0 = vector.load %arg0[%c0, %c0_0] : memref<2x128xi32, #tpu.memory_space<vmem>>, vector<1x128xi32>
    %c1 = arith.constant 1 : index
    %c0_1 = arith.constant 0 : index
    %1 = vector.load %arg0[%c1, %c0_1] : memref<2x128xi32, #tpu.memory_space<vmem>>, vector<1x128xi32>
    %2 = tpu.iota {dimensions = array<i32: 0>} : vector<16x128xi32>
    %3 = vector.broadcast %0 : vector<1x128xi32> to vector<16x128xi32>
    %4 = arith.cmpi eq, %2, %3 : vector<16x128xi32>
    %5 = arith.extui %4 : vector<16x128xi1> to vector<16x128xi32>
    %6 = arith.sitofp %5 : vector<16x128xi32> to vector<16x128xf32>
    %7 = vector.broadcast %1 : vector<1x128xi32> to vector<16x128xi32>
    %8 = arith.cmpi eq, %2, %7 : vector<16x128xi32>
    %9 = arith.extui %8 : vector<16x128xi1> to vector<16x128xi32>
    %10 = arith.sitofp %9 : vector<16x128xi32> to vector<16x128xf32>
    %cst = arith.constant dense<0.000000e+00> : vector<16x16xf32>
    %11 = tpu.matmul %10, %6, %cst {dimension_numbers = #tpu.dot_dimension_numbers<[1], [1], [0], [0], [0, 0, 1, 0], [], []>} : vector<16x128xf32>, vector<16x128xf32>, vector<16x16xf32> -> vector<16x16xf32>
    %cst_2 = arith.constant dense<0.000000e+00> : vector<16xf32>
    %12 = vector.multi_reduction <add>, %11, %cst_2 [1] : vector<16x16xf32> to vector<16xf32>
    %13 = vector.shape_cast %12 : vector<16xf32> to vector<16x1xf32>
    %cst_3 = arith.constant 1.000000e+00 : f32
    %14 = vector.broadcast %cst_3 : f32 to vector<16x1xf32>
    %15 = arith.addf %14, %13 : vector<16x1xf32>
    %16 = math.rsqrt %15 : vector<16x1xf32>
    %17 = tpu.iota {dimensions = array<i32: 0>} : vector<16x16xi32>
    %18 = tpu.iota {dimensions = array<i32: 1>} : vector<16x16xi32>
    %19 = arith.cmpi eq, %17, %18 : vector<16x16xi32>
    %20 = arith.extui %19 : vector<16x16xi1> to vector<16x16xi32>
    %21 = arith.sitofp %20 : vector<16x16xi32> to vector<16x16xf32>
    %22 = arith.addf %11, %21 : vector<16x16xf32>
    %c0_4 = arith.constant 0 : index
    %c0_5 = arith.constant 0 : index
    %23 = vector.load %arg2[%c0_4, %c0_5] : memref<384x128xf32, #tpu.memory_space<vmem>>, vector<128x128xf32>
    %c128 = arith.constant 128 : index
    %c0_6 = arith.constant 0 : index
    %24 = vector.load %arg2[%c128, %c0_6] : memref<384x128xf32, #tpu.memory_space<vmem>>, vector<128x128xf32>
    %c256 = arith.constant 256 : index
    %c0_7 = arith.constant 0 : index
    %25 = vector.load %arg2[%c256, %c0_7] : memref<384x128xf32, #tpu.memory_space<vmem>>, vector<128x128xf32>
    %c0_8 = arith.constant 0 : index
    %c0_9 = arith.constant 0 : index
    %26 = vector.load %arg3[%c0_8, %c0_9] : memref<8x128xf32, #tpu.memory_space<vmem>>, vector<1x128xf32>
    %c1_10 = arith.constant 1 : index
    %c0_11 = arith.constant 0 : index
    %27 = vector.load %arg3[%c1_10, %c0_11] : memref<8x128xf32, #tpu.memory_space<vmem>>, vector<1x128xf32>
    %c2 = arith.constant 2 : index
    %c0_12 = arith.constant 0 : index
    %28 = vector.load %arg3[%c2, %c0_12] : memref<8x128xf32, #tpu.memory_space<vmem>>, vector<1x128xf32>
    %c3 = arith.constant 3 : index
    %c0_13 = arith.constant 0 : index
    %29 = vector.load %arg3[%c3, %c0_13] : memref<8x128xf32, #tpu.memory_space<vmem>>, vector<1x128xf32>
    %c4 = arith.constant 4 : index
    %c0_14 = arith.constant 0 : index
    %30 = vector.load %arg3[%c4, %c0_14] : memref<8x128xf32, #tpu.memory_space<vmem>>, vector<1x128xf32>
    %c0_15 = arith.constant 0 : index
    %c0_16 = arith.constant 0 : index
    %31 = vector.load %arg1[%c0_15, %c0_16] : memref<16x1xf32, #tpu.memory_space<vmem>>, vector<16x1xf32>
    %32 = vector.broadcast %31 : vector<16x1xf32> to vector<16x128xf32>
    %33 = vector.broadcast %26 : vector<1x128xf32> to vector<16x128xf32>
    %34 = arith.mulf %32, %33 : vector<16x128xf32>
    %35 = vector.broadcast %16 : vector<16x1xf32> to vector<16x128xf32>
    %36 = arith.mulf %35, %34 : vector<16x128xf32>
    %cst_17 = arith.constant dense<0.000000e+00> : vector<16x128xf32>
    %37 = tpu.matmul %22, %36, %cst_17 {dimension_numbers = #tpu.dot_dimension_numbers<[1], [0], [0], [1], [0, 0, 1, 1], [], []>} : vector<16x16xf32>, vector<16x128xf32>, vector<16x128xf32> -> vector<16x128xf32>
    %38 = vector.broadcast %16 : vector<16x1xf32> to vector<16x128xf32>
    %39 = arith.mulf %38, %37 : vector<16x128xf32>
    %40 = vector.broadcast %27 : vector<1x128xf32> to vector<16x128xf32>
    %41 = arith.addf %39, %40 : vector<16x128xf32>
    %cst_18 = arith.constant 0.000000e+00 : f32
    %42 = vector.broadcast %cst_18 : f32 to vector<16x128xf32>
    %43 = arith.maximumf %41, %42 : vector<16x128xf32>
    %cst_19 = arith.constant dense<0.000000e+00> : vector<16x128xf32>
    %44 = tpu.matmul %43, %23, %cst_19 {dimension_numbers = #tpu.dot_dimension_numbers<[1], [0], [0], [1], [0, 0, 1, 1], [], []>} : vector<16x128xf32>, vector<128x128xf32>, vector<16x128xf32> -> vector<16x128xf32>
    %45 = vector.broadcast %16 : vector<16x1xf32> to vector<16x128xf32>
    %46 = arith.mulf %45, %44 : vector<16x128xf32>
    %cst_20 = arith.constant dense<0.000000e+00> : vector<16x128xf32>
    %47 = tpu.matmul %22, %46, %cst_20 {dimension_numbers = #tpu.dot_dimension_numbers<[1], [0], [0], [1], [0, 0, 1, 1], [], []>} : vector<16x16xf32>, vector<16x128xf32>, vector<16x128xf32> -> vector<16x128xf32>
    %48 = vector.broadcast %16 : vector<16x1xf32> to vector<16x128xf32>
    %49 = arith.mulf %48, %47 : vector<16x128xf32>
    %50 = vector.broadcast %28 : vector<1x128xf32> to vector<16x128xf32>
    %51 = arith.addf %49, %50 : vector<16x128xf32>
    %cst_21 = arith.constant 0.000000e+00 : f32
    %52 = vector.broadcast %cst_21 : f32 to vector<16x128xf32>
    %53 = arith.maximumf %51, %52 : vector<16x128xf32>
    %cst_22 = arith.constant dense<0.000000e+00> : vector<128xf32>
    %54 = vector.multi_reduction <add>, %53, %cst_22 [0] : vector<16x128xf32> to vector<128xf32>
    %55 = vector.shape_cast %54 : vector<128xf32> to vector<1x128xf32>
    %cst_23 = arith.constant dense<0.000000e+00> : vector<1x128xf32>
    %56 = tpu.matmul %55, %24, %cst_23 {dimension_numbers = #tpu.dot_dimension_numbers<[1], [0], [0], [1], [0, 0, 1, 1], [], []>} : vector<1x128xf32>, vector<128x128xf32>, vector<1x128xf32> -> vector<1x128xf32>
    %57 = arith.addf %56, %29 : vector<1x128xf32>
    %cst_24 = arith.constant 0.000000e+00 : f32
    %58 = vector.broadcast %cst_24 : f32 to vector<1x128xf32>
    %59 = arith.maximumf %57, %58 : vector<1x128xf32>
    %cst_25 = arith.constant dense<0.000000e+00> : vector<1x128xf32>
    %60 = tpu.matmul %59, %25, %cst_25 {dimension_numbers = #tpu.dot_dimension_numbers<[1], [0], [0], [1], [0, 0, 1, 1], [], []>} : vector<1x128xf32>, vector<128x128xf32>, vector<1x128xf32> -> vector<1x128xf32>
    %61 = arith.addf %60, %30 : vector<1x128xf32>
    %c0_26 = arith.constant 0 : index
    %c0_27 = arith.constant 0 : index
    %62 = vector.load %arg4[%c0_26, %c0_27] : memref<1x128xf32, #tpu.memory_space<vmem>>, vector<1x128xf32>
    tpu.vector_store %arg4[%c0_26, %c0_27], %61 {strides = array<i32>} : memref<1x128xf32, #tpu.memory_space<vmem>>, vector<1x128xf32>,
    return
  }
}

</mosaic_0001>

<bundles_post_ra>
// kernel: gcn_forward.1
= control target key start
LH: loop header
LB: loop body
LE: loop exit
PB: predicated region body
PF: predicated region fallthrough
CT: control target
= control target key end

     0   :  { %9 = vsyncpa [#allocation3], 0  ;;  %s1034_s0 = inlined_call_operand.vmem [shape: s32[2,128], index: 0, kind: input, shape index: {}]   ;;  %s1035_s1 = inlined_call_operand.vmem [shape: f32[16,1], index: 1, kind: input, shape index: {}]   ;;  %s1036_s2 = inlined_call_operand.hbm [shape: f32[384,128], index: 2, kind: input, shape index: {}]   ;;  %s1037_s3 = inlined_call_operand.vmem [shape: f32[8,128], index: 3, kind: input, shape index: {}]   ;;  %s1038_s4 = inlined_call_operand.hbm [shape: f32[1,128], index: 4, kind: output, shape index: {}]  }
   0x1   :  { %10 = vsyncpa [#allocation4], 0  ;;  %s910_s15 = smov [#allocation2]  }
   0x2   :  { %s20_s16 = sshll.u32 %s910_s15, 4  ;;  %s21_s16 = int_to_ptr.vmem [resolvable:$true] %s20_s16 }
   0x3   :  { %s874_s17 = scalar_lea.vmem %s21_s16, 6144  ;;  %p879_p1 = scmp.lt.s32.totalorder %s21_s16, %s21_s16 }
   0x4   :  { %p875_p0 = scmp.ne.s32.totalorder %s21_s16, %s874_s17  ;;  %p880_p2 = scmp.lt.s32.totalorder %s874_s17, %s874_s17 }
   0x6   :  { %p881_p3 = por %p880_p2, %p879_p1 }
   0x8   :  { %p882_p4 = pnand %p881_p3, %p875_p0 }
   0xa   :  { %885 = shalt.err (!%p882_p4)
}
   0xb   :  { %s911_s18 = smov 128   ;;  %s912_s19 = smov 8  }
   0xc   :  { %26 = dma.hbm_to_vmem [thread:$0]  %s1036_s2, 6144, %s21_s16, [#allocation3], %s911_s18, %s911_s18, %s912_s19  }
   0xd   :  { %906 = dma.done.wait [#allocation3], 6144  }
   0xe   :  { %907 = vsyncadd [#allocation3], 4294961152  ;;  %v34_v0 = vlaneseq  ;;  %v643_v3 = vld [vmem:[%s1034_s0] ss:$0 sm:$0xff]  ;;  %v646_v4 = vld [vmem:[%s1034_s0 + $0x1] ss:$0 sm:$0xff] }
   0xf   :  { %v913_v5 = vmov 1.0   ;;  %v207_v6 = vld [vmem:[%s1035_s1 + $0x8] sm:$0xff]  ;;  %v914_v7 = vmov 0   ;;  %v206_v8 = vld [vmem:[%s1035_s1] sm:$0xff]  ;;  %v915_v10 = vmov 0.0   ;;  %vm132_vm6 = vcmask 130048  }
  0x10   :  { %v35_v1 = vshrl.u32 %v34_v0, 7  ;;  %860 = vset.pattern.permute.xlu1 %v914_v7  ;;  %861 = vset.pattern.permute.xlu0 %v914_v7  ;;  %v144_v9 = vand.u32 127, %v34_v0  ;;  %v168_v19 = vld [vmem:[#allocation2 + $0x78] sm:$0xff]  ;;  %v167_v20 = vld [vmem:[#allocation2 + $0x70] sm:$0xff]  ;;  %v166_v21 = vld [vmem:[#allocation2 + $0x68] sm:$0xff]  ;;  %vm916_vm7 = vmmov 0  }
  0x11   :  { %215 = vperm.xlu1 %860, %v207_v6   ;;  %740 = vmatprep.subr.mxu1 %v168_v19  ;;  %v165_v22 = vld [vmem:[#allocation2 + $0x60] sm:$0xff]  ;;  %v164_v23 = vld [vmem:[#allocation2 + $0x58] sm:$0xff]  ;;  %v163_v24 = vld [vmem:[#allocation2 + $0x50] sm:$0xff]  ;;  %s917_s11 = smov [#allocation5]  }
  0x12   :  { %v36_v2 = vadd.s32 8, %v35_v1  ;;  %vm41_vm0 = vcmp.eq.s32.totalorder %v35_v1, %v643_v3  ;;  %vm51_vm2 = vcmp.eq.s32.totalorder %v35_v1, %v646_v4  ;;  %vm145_vm5 = vcmp.eq.s32.totalorder %v35_v1, %v144_v9  ;;  %741 = vmatpush3.msra.mxu1 %v168_v19  ;;  %v162_v25 = vld [vmem:[#allocation2 + $0x48] sm:$0xff]  ;;  %v161_v26 = vld [vmem:[#allocation2 + $0x40] sm:$0xff]  ;;  %v160_v27 = vld [vmem:[#allocation2 + $0x38] sm:$0xff]  ;;  %s634_s12 = sshll.u32 %s917_s11, 4  ;;  %s635_s12 = int_to_ptr.vmem [resolvable:$true] %s634_s12 }
  0x13   :  { %730 = vmatprep.mubr.msk.f32.mxu0 %vm51_vm2, %v913_v5  ;;  %v653_v13 = vsel %vm145_vm5, 1.0, %v915_v10  ;;  %742 = vmatprep.subr.mxu1 %v167_v20  ;;  %v159_v28 = vld [vmem:[#allocation2 + $0x30] sm:$0xff]  ;;  %v158_v29 = vld [vmem:[#allocation2 + $0x28] sm:$0xff]  ;;  %v655_v35 = vld [vmem:[%s1037_s3] ss:$0 sm:$0xff]  ;;  %s886_s13 = scalar_lea.vmem %s635_s12, 16  ;;  %p891_p6 = scmp.lt.s32.totalorder %s635_s12, %s635_s12 }
  0x14   :  { %vm42_vm1 = vcmp.eq.s32.totalorder %v36_v2, %v643_v3  ;;  %vm52_vm3 = vcmp.eq.s32.totalorder %v36_v2, %v646_v4  ;;  %vm146_vm4 = vcmp.eq.s32.totalorder %v36_v2, %v144_v9  ;;  %743 = vmatpush3.msra.mxu1 %v167_v20  ;;  %v157_v43 = vld [vmem:[#allocation2 + $0x20] sm:$0xff]  ;;  %v156_v44 = vld [vmem:[#allocation2 + $0x18] sm:$0xff]  ;;  %v155_v45 = vld [vmem:[#allocation2 + $0x10] sm:$0xff]  ;;  %p887_p5 = scmp.ne.s32.totalorder %s635_s12, %s886_s13  ;;  %s890_s14 = scalar_lea.vmem %s635_s12, 32 }
  0x15   :  { %726 = vmatprep.subr.msk.mxu0 %vm42_vm1, %v913_v5  ;;  %210 = vperm.xlu1 %860, %v206_v8   ;;  %v654_v11 = vsel %vm146_vm4, 1.0, %v915_v10  ;;  %v154_v46 = vld [vmem:[#allocation2 + $0x8] sm:$0xff]  ;;  %v153_v47 = vld [vmem:[#allocation2] sm:$0xff]  ;;  %v184_v61 = vld [vmem:[#allocation2 + $0xf8] sm:$0xff]  ;;  %p892_p7 = scmp.lt.s32.totalorder %s890_s14, %s886_s13 }
  0x16   :  { %727 = vmatpush3.xpose.msk.msra.mxu0 %vm42_vm1, %v913_v5  ;;  %744 = vmatprep.subr.mxu1 %v166_v21  ;;  %v658_v50 = vld [vmem:[%s1037_s3 + $0x1] ss:$0 sm:$0xff]  ;;  %v183_v62 = vld [vmem:[#allocation2 + $0xf0] sm:$0xff]  ;;  %v182_v63 = vld [vmem:[#allocation2 + $0xe8] sm:$0xff] }
  0x17   :  { %728 = vmatprep.subr.msk.mxu0 %vm41_vm0, %v913_v5  ;;  %745 = vmatpush3.msra.mxu1 %v166_v21  ;;  %v181_v0 = vld [vmem:[#allocation2 + $0xe0] sm:$0xff]  ;;  %v180_v1 = vld [vmem:[#allocation2 + $0xd8] sm:$0xff]  ;;  %v179_v2 = vld [vmem:[#allocation2 + $0xd0] sm:$0xff]  ;;  %p893_p8 = por %p892_p7, %p891_p6 }
  0x18   :  { %746 = vmatprep.subr.mxu1 %v165_v22  ;;  %v178_v3 = vld [vmem:[#allocation2 + $0xc8] sm:$0xff]  ;;  %v177_v4 = vld [vmem:[#allocation2 + $0xc0] sm:$0xff]  ;;  %v175_v6 = vld [vmem:[#allocation2 + $0xb0] sm:$0xff] }
  0x19   :  { %747 = vmatpush3.msra.mxu1 %v165_v22  ;;  %v174_v7 = vld [vmem:[#allocation2 + $0xa8] sm:$0xff]  ;;  %v173_v8 = vld [vmem:[#allocation2 + $0xa0] sm:$0xff]  ;;  %v172_v9 = vld [vmem:[#allocation2 + $0x98] sm:$0xff]  ;;  %p894_p9 = pnand %p893_p8, %p887_p5 }
  0x1a   :  { %729 = vmatpush3.xpose.msk.msra.mxu0 %vm41_vm0, %v913_v5  ;;  %748 = vmatprep.subr.mxu1 %v164_v23  ;;  %v195_v19 = vld [vmem:[#allocation2 + $0x150] sm:$0xff]  ;;  %v194_v20 = vld [vmem:[#allocation2 + $0x148] sm:$0xff]  ;;  %v193_v21 = vld [vmem:[#allocation2 + $0x140] sm:$0xff] }
  0x1b   :  { %749 = vmatpush3.msra.mxu1 %v164_v23  ;;  %v192_v22 = vld [vmem:[#allocation2 + $0x138] sm:$0xff]  ;;  %v191_v23 = vld [vmem:[#allocation2 + $0x130] sm:$0xff] }
  0x1c   :  { %750 = vmatprep.subr.mxu1 %v163_v24 }
  0x1d   :  { %731 = vmatmul.mubr.msk.f32.vlgmr.msra.gmra.mxu0 %vm52_vm3, %v913_v5  ;;  %751 = vmatpush3.msra.mxu1 %v163_v24  ;;  %v176_v5 = vld [vmem:[#allocation2 + $0xb8] sm:$0xff]  ;;  %v190_v24 = vld [vmem:[#allocation2 + $0x128] sm:$0xff] }
  0x1e   :  { %752 = vmatprep.subr.mxu1 %v162_v25 }
  0x1f   :  { %753 = vmatpush3.msra.mxu1 %v162_v25  ;;  %v189_v25 = vld [vmem:[#allocation2 + $0x120] sm:$0xff] }
  0x20   :  { %754 = vmatprep.subr.mxu1 %v161_v26 }
  0x21   :  { %755 = vmatpush3.msra.mxu1 %v161_v26  ;;  %v188_v26 = vld [vmem:[#allocation2 + $0x118] sm:$0xff] }
  0x22   :  { %756 = vmatprep.subr.mxu1 %v160_v27 }
  0x23   :  { %757 = vmatpush3.msra.mxu1 %v160_v27  ;;  %v661_v27 = vld [vmem:[%s1037_s3 + $0x2] ss:$0 sm:$0xff] }
  0x24   :  { %758 = vmatprep.subr.mxu1 %v159_v28 }
  0x25   :  { %759 = vmatpush3.msra.mxu1 %v159_v28 }
  0x26   :  { %760 = vmatprep.subr.mxu1 %v158_v29 }
  0x27   :  { %761 = vmatpush3.msra.mxu1 %v158_v29 }
  0x28   :  { %762 = vmatprep.subr.mxu1 %v157_v43 }
  0x29   :  { %763 = vmatpush3.msra.mxu1 %v157_v43 }
  0x2a   :  { %764 = vmatprep.subr.mxu1 %v156_v44 }
  0x2b   :  { %765 = vmatpush3.msra.mxu1 %v156_v44 }
  0x2c   :  { %766 = vmatprep.subr.mxu1 %v155_v45 }
  0x2d   :  { %767 = vmatpush3.msra.mxu1 %v155_v45  ;;  %v187_v45 = vld [vmem:[#allocation2 + $0x110] sm:$0xff] }
  0x2e   :  { %768 = vmatprep.subr.mxu1 %v154_v46 }
  0x2f   :  { %769 = vmatpush3.msra.mxu1 %v154_v46  ;;  %v204_v46 = vld [vmem:[%s1037_s3 + $0x3] sm:$0x1] }
  0x30   :  { %770 = vmatprep.subr.mxu1 %v153_v47 }
  0x31   :  { %771 = vmatpush3.msra.mxu1 %v153_v47 }
  0x32   :  { %817 = vmatprep.subr.mxu1 %v915_v10 }
  0x8c   :  { %v216_v34 = vpop.permute.xlu1 %215 }
  0x8d   :  { %v223_v36 = vmul.f32 %v655_v35, %v216_v34 }
  0x90   :  { %v211_v38 = vpop.permute.xlu1 %210 }
  0x91   :  { %v222_v40 = vmul.f32 %v655_v35, %v211_v38 }
  0xdd   :  { %v732_v12 = vpop.f32.mrf.mxu0 }
  0xde   :  { %v960_v14 = vadd.f32 %v732_v12, %v654_v11  ;;  %v136_v15 = vsel %vm132_vm6, %v732_v12, 0.0  ;;  %v171_v11 = vld [vmem:[#allocation2 + $0x90] sm:$0xff]  ;;  %v170_v12 = vld [vmem:[#allocation2 + $0x88] sm:$0xff] }
  0xdf   :  { %137 = vadd.xlane.f32.xlu0 %v136_v15  ;;  %v123_v16 = vpop.f32.mrf.mxu0  ;;  %v199_v15 = vld [vmem:[#allocation2 + $0x170] sm:$0xff] }
  0xe0   :  { %v151_v17 = vadd.f32 %v653_v13, %v123_v16  ;;  %v133_v18 = vsel %vm132_vm6, %v123_v16, 0.0  ;;  %v169_v13 = vld [vmem:[#allocation2 + $0x80] sm:$0xff]  ;;  %v198_v16 = vld [vmem:[#allocation2 + $0x168] sm:$0xff] }
  0xe2   :  { %737 = vmatprep.mubr.msk.f32.mxu0 %vm132_vm6, %v151_v17 }
  0xe3   :  { %134 = vadd.xlane.f32.xlu0 %v133_v18  ;;  %v196_v18 = vld [vmem:[#allocation2 + $0x158] sm:$0xff] }
 0x168   :  { %v138_v30 = vpop.xlane.xlu0 %137 }
 0x169   :  { %v140_v31 = vadd.f32 1.0, %v138_v30 }
 0x16b   :  { %862 = vrsqrt.f32 %v140_v31 }
 0x16c   :  { %v135_v32 = vpop.xlane.xlu0 %134 }
 0x16d   :  { %v139_v33 = vadd.f32 1.0, %v135_v32 }
 0x16f   :  { %864 = vrsqrt.f32 %v139_v33 }
 0x178   :  { %v968_v37 = vpop.eup %862 }
 0x179   :  { %v225_v39 = vmul.f32 %v968_v37, %v223_v36 }
 0x17b   :  { %733 = vmatprep.subr.mxu0 %v225_v39 }
 0x17c   :  { %v971_v41 = vpop.eup %864  ;;  %734 = vmatpush3.msra.mxu0 %v225_v39 }
 0x17d   :  { %v224_v42 = vmul.f32 %v971_v41, %v222_v40 }
 0x17f   :  { %735 = vmatprep.subr.mxu0 %v224_v42 }
 0x180   :  { %736 = vmatpush3.msra.mxu0 %v224_v42 }
 0x181   :  { %738 = vmatmul.mubr.msk.f32.vlgmr.msra.gmra.mxu0 %vm132_vm6, %v960_v14 }
 0x182   :  { %779 = vmatprep.mubr.msk.f32.mxu0 %vm132_vm6, %v151_v17  ;;  %v197_v17 = vld [vmem:[#allocation2 + $0x160] sm:$0xff] }
 0x241   :  { %v739_v48 = vpop.f32.mrf.mxu0 }
 0x242   :  { %v308_v49 = vmul.f32 %v968_v37, %v739_v48 }
 0x243   :  { %v298_v51 = vpop.f32.mrf.mxu0 }
 0x244   :  { %v307_v52 = vmul.f32 %v971_v41, %v298_v51  ;;  %v314_v53 = vadd.f32 %v658_v50, %v308_v49  ;;  %v205_v51 = vld [vmem:[%s1037_s3 + $0x4] sm:$0x1] }
 0x246   :  { %v313_v54 = vadd.f32 %v658_v50, %v307_v52  ;;  %v316_v56 = vmax.f32 %v314_v53, 0.0 }
 0x248   :  { %v315_v55 = vmax.f32 %v313_v54, 0.0 }
 0x24a   :  { %772 = vmatprep.mubr.f32.mxu1 %v315_v55 }
 0x24b   :  { %773 = vmatmul.mubr.f32.vlgmr.msra.gmra.mxu1 %v316_v56 }
 0x24c   :  { %849 = vmatprep.mubr.msk.f32.mxu1 %vm916_vm7, %v915_v10 }
 0x30b   :  { %v774_v57 = vpop.f32.mrf.mxu1 }
 0x30c   :  { %v393_v58 = vmul.f32 %v968_v37, %v774_v57 }
 0x30d   :  { %v383_v59 = vpop.f32.mrf.mxu1 }
 0x30e   :  { %v392_v60 = vmul.f32 %v971_v41, %v383_v59  ;;  %775 = vmatprep.subr.mxu0 %v393_v58 }
 0x30f   :  { %776 = vmatpush3.msra.mxu0 %v393_v58 }
 0x310   :  { %777 = vmatprep.subr.mxu0 %v392_v60 }
 0x311   :  { %778 = vmatpush3.msra.mxu0 %v392_v60 }
 0x312   :  { %780 = vmatmul.mubr.msk.f32.vlgmr.msra.gmra.mxu0 %vm132_vm6, %v960_v14  ;;  %782 = vmatprep.subr.mxu0 %v915_v10  ;;  %v200_v14 = vld [vmem:[#allocation2 + $0x178] sm:$0xff] }
 0x313   :  { %783 = vmatpush3.msra.mxu0 %v184_v61  ;;  %814 = vmatprep.mubr.msk.f32.mxu0 %vm916_vm7, %v915_v10 }
 0x314   :  { %784 = vmatprep.subr.mxu0 %v915_v10  ;;  %818 = vmatpush3.msra.mxu1 %v200_v14 }
 0x315   :  { %785 = vmatpush3.msra.mxu0 %v183_v62  ;;  %819 = vmatprep.subr.mxu1 %v915_v10 }
 0x316   :  { %786 = vmatprep.subr.mxu0 %v915_v10  ;;  %820 = vmatpush3.msra.mxu1 %v199_v15 }
 0x317   :  { %787 = vmatpush3.msra.mxu0 %v182_v63  ;;  %821 = vmatprep.subr.mxu1 %v915_v10 }
 0x318   :  { %788 = vmatprep.subr.mxu0 %v915_v10  ;;  %822 = vmatpush3.msra.mxu1 %v198_v16 }
 0x319   :  { %789 = vmatpush3.msra.mxu0 %v181_v0  ;;  %823 = vmatprep.subr.mxu1 %v915_v10 }
 0x31a   :  { %790 = vmatprep.subr.mxu0 %v915_v10  ;;  %824 = vmatpush3.msra.mxu1 %v197_v17 }
 0x31b   :  { %791 = vmatpush3.msra.mxu0 %v180_v1  ;;  %825 = vmatprep.subr.mxu1 %v915_v10 }
 0x31c   :  { %792 = vmatprep.subr.mxu0 %v915_v10  ;;  %826 = vmatpush3.msra.mxu1 %v196_v18 }
 0x31d   :  { %793 = vmatpush3.msra.mxu0 %v179_v2  ;;  %827 = vmatprep.subr.mxu1 %v915_v10 }
 0x31e   :  { %794 = vmatprep.subr.mxu0 %v915_v10  ;;  %828 = vmatpush3.msra.mxu1 %v195_v19 }
 0x31f   :  { %795 = vmatpush3.msra.mxu0 %v178_v3  ;;  %829 = vmatprep.subr.mxu1 %v915_v10 }
 0x320   :  { %796 = vmatprep.subr.mxu0 %v915_v10  ;;  %830 = vmatpush3.msra.mxu1 %v194_v20 }
 0x321   :  { %797 = vmatpush3.msra.mxu0 %v177_v4  ;;  %831 = vmatprep.subr.mxu1 %v915_v10 }
 0x322   :  { %798 = vmatprep.subr.mxu0 %v915_v10  ;;  %832 = vmatpush3.msra.mxu1 %v193_v21 }
 0x323   :  { %799 = vmatpush3.msra.mxu0 %v176_v5  ;;  %833 = vmatprep.subr.mxu1 %v915_v10 }
 0x324   :  { %800 = vmatprep.subr.mxu0 %v915_v10  ;;  %834 = vmatpush3.msra.mxu1 %v192_v22 }
 0x325   :  { %801 = vmatpush3.msra.mxu0 %v175_v6  ;;  %835 = vmatprep.subr.mxu1 %v915_v10 }
 0x326   :  { %802 = vmatprep.subr.mxu0 %v915_v10  ;;  %836 = vmatpush3.msra.mxu1 %v191_v23 }
 0x327   :  { %803 = vmatpush3.msra.mxu0 %v174_v7  ;;  %837 = vmatprep.subr.mxu1 %v915_v10 }
 0x328   :  { %804 = vmatprep.subr.mxu0 %v915_v10  ;;  %838 = vmatpush3.msra.mxu1 %v190_v24 }
 0x329   :  { %805 = vmatpush3.msra.mxu0 %v173_v8  ;;  %839 = vmatprep.subr.mxu1 %v915_v10 }
 0x32a   :  { %806 = vmatprep.subr.mxu0 %v915_v10  ;;  %840 = vmatpush3.msra.mxu1 %v189_v25 }
 0x32b   :  { %807 = vmatpush3.msra.mxu0 %v172_v9  ;;  %841 = vmatprep.subr.mxu1 %v915_v10 }
 0x32c   :  { %808 = vmatprep.subr.mxu0 %v915_v10  ;;  %842 = vmatpush3.msra.mxu1 %v188_v26 }
 0x32d   :  { %809 = vmatpush3.msra.mxu0 %v171_v11  ;;  %843 = vmatprep.subr.mxu1 %v915_v10 }
 0x32e   :  { %810 = vmatprep.subr.mxu0 %v915_v10  ;;  %844 = vmatpush3.msra.mxu1 %v187_v45 }
 0x32f   :  { %811 = vmatpush3.msra.mxu0 %v170_v12  ;;  %845 = vmatprep.subr.mxu1 %v915_v10 }
 0x330   :  { %812 = vmatprep.subr.mxu0 %v915_v10 }
 0x331   :  { %813 = vmatpush3.msra.mxu0 %v169_v13 }
 0x3d2   :  { %v781_v28 = vpop.f32.mrf.mxu0 }
 0x3d3   :  { %v470_v29 = vmul.f32 %v968_v37, %v781_v28  ;;  %v186_v37 = vld [vmem:[#allocation2 + $0x108] sm:$0xff] }
 0x3d4   :  { %v460_v30 = vpop.f32.mrf.mxu0  ;;  %846 = vmatpush3.msra.mxu1 %v186_v37 }
 0x3d5   :  { %v476_v31 = vadd.f32 %v661_v27, %v470_v29  ;;  %v469_v32 = vmul.f32 %v971_v41, %v460_v30  ;;  %847 = vmatprep.subr.mxu1 %v915_v10  ;;  %v185_v41 = vld [vmem:[#allocation2 + $0x100] sm:$0xff] }
 0x3d6   :  { %848 = vmatpush3.msra.mxu1 %v185_v41 }
 0x3d7   :  { %v475_v33 = vadd.f32 %v661_v27, %v469_v32  ;;  %v478_v34 = vmax.f32 %v476_v31, 0.0 }
 0x3d9   :  { %v477_v35 = vmax.f32 %v475_v33, 0.0 }
 0x3db   :  { %v479_v36 = vadd.f32 %v478_v34, %v477_v35 }
 0x3dd   :  { %v480_v38 = vrot.slane %v479_v36, 4 }
 0x3df   :  { %v481_v39 = vadd.f32 %v480_v38, %v479_v36 }
 0x3e1   :  { %v482_v40 = vrot.slane %v481_v39, 2 }
 0x3e3   :  { %v483_v42 = vadd.f32 %v482_v40, %v481_v39 }
 0x3e5   :  { %v484_v43 = vrot.slane %v483_v42, 1 }
 0x3e7   :  { %v485_v44 = vadd.f32 %v484_v43, %v483_v42 }
 0x3e9   :  { %815 = vmatmul.mubr.f32.vlgmr.msra.gmra.mxu0 %v485_v44 }
 0x4a9   :  { %v552_v47 = vpop.f32.mrf.mxu0 }
 0x4aa   :  { %v553_v48 = vadd.f32 %v552_v47, %v204_v46 }
 0x4ab   :  { %v816_v49 = vpop.f32.mrf.mxu0 }
 0x4ac   :  { %v556_v50 = vmax.f32 %v553_v48, 0.0 }
 0x4ae   :  { %850 = vmatmul.mubr.f32.vlgmr.msra.gmra.mxu1 %v556_v50 }
 0x56e   :  { %v623_v52 = vpop.f32.mrf.mxu1 }
 0x56f   :  { %v624_v53 = vadd.f32 %v623_v52, %v205_v51 }
 0x570   :  { %v851_v10 = vpop.f32.mrf.mxu1 }
 0x571   :  { %627 = vst [vmem:[#allocation5] sm:$0x1] %v624_v53 }
 0x572   :  { %897 = shalt.err (!%p894_p9)
}
 0x573   :  { %637 = dma.vmem_to_hbm [thread:$0]  %s635_s12, 16, %s1038_s4, [#allocation4]  }
 0x574   :  { %908 = dma.done.wait [#allocation4], 16  }
 0x575   :  { %909 = vsyncadd [#allocation4], 4294967280 }
 0x576   :  { %641 = vsyncpa [#allocation3], 1 }
 0x577   :  { %642 = vsyncpa [#allocation4], 1 }

</bundles_post_ra>
